<compile_context>
chip_gen: v5e
topology: v5e:2x2
jax: 0.10.0
libtpu: 0.0.40
codegen_flags: <defaults>
</compile_context>

<pallas_src>
import functools

import jax
import jax.numpy as jnp
from jax.experimental import pallas as pl
from jax.experimental.pallas import tpu as pltpu


def _cdiv(a, b):
    return -(-a // b)


def _round_up(a, b):
    return _cdiv(a, b) * b


# ---------------------------------------------------------------------------
# Kernels
# ---------------------------------------------------------------------------
def _dwsep_direct_kernel(x_ref, wf_ref, bf_ref, o_ref, *, K, Cin_pad, Wp, TILE_L):
    """Small-Cin path: K*K tap matmuls accumulated in registers (no scratch).

    x_ref : (1, Cin_pad, TILE_IN)   windowed input tile (tile + halo)
    wf_ref: (K*K, Cout, Cin_pad)    fused depthwise*pointwise weights
    bf_ref: (Cout, 1)               fused bias
    o_ref : (1, Cout, TILE_L)       lane-dense output tile
    """
    acc = None
    for kh in range(K):
        for kw in range(K):
            off = kh * Wp + kw                        # static lane offset
            tap = x_ref[0, :, off:off + TILE_L]       # (Cin_pad, TILE_L)
            w_t = wf_ref[kh * K + kw]                 # (Cout, Cin_pad)
            p = jnp.dot(w_t, tap, preferred_element_type=jnp.float32)
            acc = p if acc is None else acc + p
    o_ref[0] = (acc + bf_ref[...]).astype(o_ref.dtype)


def _dwsep_im2col_kernel(x_ref, wf_ref, bf_ref, o_ref, t_ref, *,
                         K, Cin_pad, Wp, TILE_L):
    """Large-Cin path: build an im2col tap matrix then ONE MXU matmul.

    x_ref : (1, Cin_pad, TILE_IN)
    wf_ref: (Cout, K*K*Cin_pad)
    bf_ref: (Cout, 1)
    o_ref : (1, Cout, TILE_L)
    t_ref : (K*K*Cin_pad, TILE_L)   VMEM scratch (f32 or bf16)
    """
    for kh in range(K):
        for kw in range(K):
            off = kh * Wp + kw
            r = (kh * K + kw) * Cin_pad               # multiple of 8/16 -> aligned stores
            t_ref[r:r + Cin_pad, :] = x_ref[0, :, off:off + TILE_L].astype(t_ref.dtype)
    y = jnp.dot(wf_ref[...], t_ref[...], preferred_element_type=jnp.float32)
    o_ref[0] = (y + bf_ref[...]).astype(o_ref.dtype)


# ---------------------------------------------------------------------------
# Wrapper
# ---------------------------------------------------------------------------
def depthwise_separable_conv2d(x_nchw, dw_weight, dw_bias, pw_weight, pw_bias,
                               *, padding=1, stride=1,
                               compute_dtype=jnp.float32):
    """
    x_nchw   : (N, Cin, H, W)
    dw_weight: (Cin, 1, K, K)   PyTorch depthwise conv weight layout
    dw_bias  : (Cin,)
    pw_weight: (Cout, Cin, 1, 1)
    pw_bias  : (Cout,)
    compute_dtype: dtype of fused weights / im2col scratch.  Use jnp.bfloat16
                   on v6e/v7x for 2x MXU throughput (f32 accumulate is kept).
    """
    if stride != 1:
        # TODO(synk): strided depthwise conv needs a strided output-lane map.
        raise NotImplementedError("only stride=1 is implemented")

    N, Cin, H, W = x_nchw.shape
    K = dw_weight.shape[-1]
    Cout = pw_weight.shape[0]
    Hp, Wp = H + 2 * padding, W + 2 * padding
    Hout, Wout = Hp - K + 1, Wp - K + 1

    itm_x = jnp.dtype(x_nchw.dtype).itemsize
    itm_c = jnp.dtype(compute_dtype).itemsize
    sub = 8 * (4 // itm_c)                  # sublane group: 8 (f32) / 16 (bf16)
    Cin_pad = _round_up(Cin, sub)
    KKC = K * K * Cin_pad
    use_im2col = Cin_pad >= 32              # tiny Cin: direct taps (v5e-friendly)

    # ---- fuse depthwise + pointwise weights / bias (tiny, wrapper-side) -----
    # NOTE: valid only because there is no nonlinearity between the two convs.
    dww = dw_weight[:, 0, :, :]                       # (Cin, K, K)
    pww = pw_weight[:, :, 0, 0]                       # (Cout, Cin)
    wf4 = jnp.einsum('oc,ckl->oklc', pww, dww)        # (Cout, K, K, Cin)
    wf4 = jnp.pad(wf4, ((0, 0), (0, 0), (0, 0), (0, Cin_pad - Cin)))
    bf = (pw_bias + pww @ dw_bias).reshape(Cout, 1).astype(jnp.float32)
    if use_im2col:
        wf = wf4.reshape(Cout, KKC).astype(compute_dtype)
    else:
        wf = jnp.transpose(wf4, (1, 2, 0, 3)).reshape(K * K, Cout, Cin_pad)
        wf = wf.astype(compute_dtype)

    # ---- channels-first, whole batch flattened onto one lane axis -----------
    # (single jnp.pad covers channel padding + spatial conv padding)
    x_pad = jnp.pad(x_nchw, ((0, 0), (0, Cin_pad - Cin),
                             (padding, padding), (padding, padding)))
    Lflat = N * Hp * Wp
    x_flat = jnp.transpose(x_pad, (1, 0, 2, 3)).reshape(Cin_pad, Lflat)

    # ---- lane tiling sized for a v7x-safe VMEM budget ------------------------
    max_off = (K - 1) * Wp + (K - 1)                  # largest tap lane offset
    halo = _round_up(max_off, 128)
    per_lane = (2 * Cin_pad * itm_x + 2 * Cout * itm_x
                + (KKC * itm_c if use_im2col else 0))
    tile_cap = max(128, min(2048, ((16 << 20) // per_lane) // 128 * 128))
    n_tiles = _cdiv(Lflat, tile_cap)
    if n_tiles < 2 and Lflat > 256:
        n_tiles = 2                                   # >=2 parallel steps (v7x megacore)
    TILE_L = _round_up(_cdiv(Lflat, n_tiles), 128)
    n_tiles = _cdiv(Lflat, TILE_L)
    TILE_IN = TILE_L + halo                           # tile + halo, multiple of 128

    # Overlapping input windows (tile + halo) so every tap in the kernel is a
    # static lane slice and each grid step DMAs only its own window.
    Lsrc = (n_tiles - 1) * TILE_L + TILE_IN
    x_flat = jnp.pad(x_flat, ((0, 0), (0, Lsrc - Lflat)))
    win = (jnp.arange(n_tiles) * TILE_L)[:, None] + jnp.arange(TILE_IN)[None, :]
    x_win = jnp.transpose(x_flat[:, win], (1, 0, 2))  # (n_tiles, Cin_pad, TILE_IN)

    if use_im2col:
        kernel = functools.partial(_dwsep_im2col_kernel, K=K, Cin_pad=Cin_pad,
                                   Wp=Wp, TILE_L=TILE_L)
        wf_spec = pl.BlockSpec((Cout, KKC), lambda t: (0, 0))
        scratch = [pltpu.VMEM((KKC, TILE_L), compute_dtype)]
    else:
        kernel = functools.partial(_dwsep_direct_kernel, K=K, Cin_pad=Cin_pad,
                                   Wp=Wp, TILE_L=TILE_L)
        wf_spec = pl.BlockSpec((K * K, Cout, Cin_pad), lambda t: (0, 0, 0))
        scratch = []

    vmem_est = (2 * Cin_pad * TILE_IN * itm_x         # input tile, double-buffered
                + 2 * Cout * TILE_L * itm_x           # output tile, double-buffered
                + Cout * KKC * itm_c + Cout * 4       # fused weights + bias
                + (KKC * TILE_L * itm_c if use_im2col else 0))
    vmem_limit = int(min(56 << 20, max(32 << 20, 2 * vmem_est)))

    out = pl.pallas_call(
        kernel,
        out_shape=jax.ShapeDtypeStruct((n_tiles, Cout, TILE_L), x_nchw.dtype),
        grid_spec=pltpu.PrefetchScalarGridSpec(
            num_scalar_prefetch=0,
            grid=(n_tiles,),
            in_specs=[
                pl.BlockSpec((1, Cin_pad, TILE_IN), lambda t: (t, 0, 0)),
                wf_spec,
                pl.BlockSpec((Cout, 1), lambda t: (0, 0)),
            ],
            out_specs=pl.BlockSpec((1, Cout, TILE_L), lambda t: (t, 0, 0)),
            scratch_shapes=scratch,
        ),
        compiler_params=pltpu.CompilerParams(
            dimension_semantics=("parallel",),
            vmem_limit_bytes=vmem_limit),
    )(x_win, wf, bf)

    # Strip padding: lane q = n*Hp*Wp + h*Wp + w  ->  output (n, :, h, w).
    out = jnp.transpose(out, (1, 0, 2)).reshape(Cout, n_tiles * TILE_L)[:, :Lflat]
    out = out.reshape(Cout, N, Hp, Wp).transpose(1, 0, 2, 3)[:, :, :Hout, :Wout]
    return out


# ---------------------------------------------------------------------------
# Pure-JAX reference
# ---------------------------------------------------------------------------
def _reference(x_nchw, dw_weight, dw_bias, pw_weight, pw_bias, *, padding=1):
    Cin = x_nchw.shape[1]
    dw = jax.lax.conv_general_dilated(
        x_nchw, dw_weight, window_strides=(1, 1),
        padding=[(padding, padding), (padding, padding)],
        dimension_numbers=("NCHW", "OIHW", "NCHW"),
        feature_group_count=Cin)
    dw = dw + dw_bias[None, :, None, None]
    pw = jax.lax.conv_general_dilated(
        dw, pw_weight, window_strides=(1, 1), padding=[(0, 0), (0, 0)],
        dimension_numbers=("NCHW", "OIHW", "NCHW"))
    return pw + pw_bias[None, :, None, None]


if __name__ == "__main__":
    def _run_case(N, Cin, H, W, Cout, K, pad, key):
        kx, k1, k2, k3, k4 = jax.random.split(key, 5)
        x = jax.random.normal(kx, (N, Cin, H, W), dtype=jnp.float32)
        dw_w = jax.random.normal(k1, (Cin, 1, K, K), dtype=jnp.float32) * 0.1
        dw_b = jax.random.normal(k2, (Cin,), dtype=jnp.float32) * 0.1
        pw_w = jax.random.normal(k3, (Cout, Cin, 1, 1), dtype=jnp.float32) * 0.1
        pw_b = jax.random.normal(k4, (Cout,), dtype=jnp.float32) * 0.1

        out = depthwise_separable_conv2d(x, dw_w, dw_b, pw_w, pw_b, padding=pad)
        out = jax.block_until_ready(out)

        ref = _reference(x, dw_w, dw_b, pw_w, pw_b, padding=pad)
        assert out.shape == ref.shape, (out.shape, ref.shape)
        err = float(jnp.max(jnp.abs(out - ref)))
        assert jnp.allclose(out, ref, atol=1e-4, rtol=1e-4), err

    key = jax.random.PRNGKey(0)
    k0, k1 = jax.random.split(key)

    # Primary (spec) shape: exercises the small-Cin direct-tap path.
    _run_case(2, 4, 16, 16, 8, 3, 1, k0)
    # Larger-Cin shape: exercises the im2col + single-fused-matmul path.
    _run_case(1, 32, 8, 8, 16, 3, 1, k1)

    print("KERNEL_OK")
</pallas_src>

<mosaic_0001>
module attributes {stable_mosaic.version = 11 : i64} {
  func.func @_dwsep_direct_kernel(%arg0: i32, %arg1: memref<1x8x512xf32, #tpu.memory_space<vmem>>, %arg2: memref<9x8x8xf32, #tpu.memory_space<vmem>>, %arg3: memref<8x1xf32, #tpu.memory_space<vmem>>, %arg4: memref<1x8x384xf32, #tpu.memory_space<vmem>>) attributes {dimension_semantics = [#tpu.dimension_semantics<parallel>], iteration_bounds = array<i64: 2>, scalar_prefetch = 0 : i64, scratch_operands = 0 : i64, tpu.core_type = #tpu.core_type<tc>, window_params = [{transform_indices = @transform_0, window_bounds = array<i64: 1, 8, 512>}, {pipeline_mode = #tpu.pipeline_mode<synchronous>, transform_indices = @transform_1, window_bounds = array<i64: 9, 8, 8>}, {pipeline_mode = #tpu.pipeline_mode<synchronous>, transform_indices = @transform_2, window_bounds = array<i64: 8, 1>}, {transform_indices = @transform_3, window_bounds = array<i64: 1, 8, 384>}]} {
    %c0 = arith.constant 0 : index
    %c0_0 = arith.constant 0 : index
    %c0_1 = arith.constant 0 : index
    %0 = vector.load %arg1[%c0, %c0_0, %c0_1] : memref<1x8x512xf32, #tpu.memory_space<vmem>>, vector<1x8x384xf32>
    %1 = vector.shape_cast %0 : vector<1x8x384xf32> to vector<8x384xf32>
    %c0_2 = arith.constant 0 : index
    %c0_3 = arith.constant 0 : index
    %c0_4 = arith.constant 0 : index
    %2 = vector.load %arg2[%c0_2, %c0_3, %c0_4] : memref<9x8x8xf32, #tpu.memory_space<vmem>>, vector<1x8x8xf32>
    %3 = vector.shape_cast %2 : vector<1x8x8xf32> to vector<8x8xf32>
    %cst = arith.constant dense<0.000000e+00> : vector<8x384xf32>
    %4 = tpu.matmul %3, %1, %cst {dimension_numbers = #tpu.dot_dimension_numbers<[1], [0], [0], [1], [0, 0, 1, 1], [], []>} : vector<8x8xf32>, vector<8x384xf32>, vector<8x384xf32> -> vector<8x384xf32>
    %c0_5 = arith.constant 0 : index
    %c0_6 = arith.constant 0 : index
    %c1 = arith.constant 1 : index
    %5 = vector.load %arg1[%c0_5, %c0_6, %c1] : memref<1x8x512xf32, #tpu.memory_space<vmem>>, vector<1x8x384xf32>
    %6 = vector.shape_cast %5 : vector<1x8x384xf32> to vector<8x384xf32>
    %c1_7 = arith.constant 1 : index
    %c0_8 = arith.constant 0 : index
    %c0_9 = arith.constant 0 : index
    %7 = vector.load %arg2[%c1_7, %c0_8, %c0_9] : memref<9x8x8xf32, #tpu.memory_space<vmem>>, vector<1x8x8xf32>
    %8 = vector.shape_cast %7 : vector<1x8x8xf32> to vector<8x8xf32>
    %cst_10 = arith.constant dense<0.000000e+00> : vector<8x384xf32>
    %9 = tpu.matmul %8, %6, %cst_10 {dimension_numbers = #tpu.dot_dimension_numbers<[1], [0], [0], [1], [0, 0, 1, 1], [], []>} : vector<8x8xf32>, vector<8x384xf32>, vector<8x384xf32> -> vector<8x384xf32>
    %10 = arith.addf %4, %9 : vector<8x384xf32>
    %c0_11 = arith.constant 0 : index
    %c0_12 = arith.constant 0 : index
    %c2 = arith.constant 2 : index
    %11 = vector.load %arg1[%c0_11, %c0_12, %c2] : memref<1x8x512xf32, #tpu.memory_space<vmem>>, vector<1x8x384xf32>
    %12 = vector.shape_cast %11 : vector<1x8x384xf32> to vector<8x384xf32>
    %c2_13 = arith.constant 2 : index
    %c0_14 = arith.constant 0 : index
    %c0_15 = arith.constant 0 : index
    %13 = vector.load %arg2[%c2_13, %c0_14, %c0_15] : memref<9x8x8xf32, #tpu.memory_space<vmem>>, vector<1x8x8xf32>
    %14 = vector.shape_cast %13 : vector<1x8x8xf32> to vector<8x8xf32>
    %cst_16 = arith.constant dense<0.000000e+00> : vector<8x384xf32>
    %15 = tpu.matmul %14, %12, %cst_16 {dimension_numbers = #tpu.dot_dimension_numbers<[1], [0], [0], [1], [0, 0, 1, 1], [], []>} : vector<8x8xf32>, vector<8x384xf32>, vector<8x384xf32> -> vector<8x384xf32>
    %16 = arith.addf %10, %15 : vector<8x384xf32>
    %c0_17 = arith.constant 0 : index
    %c0_18 = arith.constant 0 : index
    %c18 = arith.constant 18 : index
    %17 = vector.load %arg1[%c0_17, %c0_18, %c18] : memref<1x8x512xf32, #tpu.memory_space<vmem>>, vector<1x8x384xf32>
    %18 = vector.shape_cast %17 : vector<1x8x384xf32> to vector<8x384xf32>
    %c3 = arith.constant 3 : index
    %c0_19 = arith.constant 0 : index
    %c0_20 = arith.constant 0 : index
    %19 = vector.load %arg2[%c3, %c0_19, %c0_20] : memref<9x8x8xf32, #tpu.memory_space<vmem>>, vector<1x8x8xf32>
    %20 = vector.shape_cast %19 : vector<1x8x8xf32> to vector<8x8xf32>
    %cst_21 = arith.constant dense<0.000000e+00> : vector<8x384xf32>
    %21 = tpu.matmul %20, %18, %cst_21 {dimension_numbers = #tpu.dot_dimension_numbers<[1], [0], [0], [1], [0, 0, 1, 1], [], []>} : vector<8x8xf32>, vector<8x384xf32>, vector<8x384xf32> -> vector<8x384xf32>
    %22 = arith.addf %16, %21 : vector<8x384xf32>
    %c0_22 = arith.constant 0 : index
    %c0_23 = arith.constant 0 : index
    %c19 = arith.constant 19 : index
    %23 = vector.load %arg1[%c0_22, %c0_23, %c19] : memref<1x8x512xf32, #tpu.memory_space<vmem>>, vector<1x8x384xf32>
    %24 = vector.shape_cast %23 : vector<1x8x384xf32> to vector<8x384xf32>
    %c4 = arith.constant 4 : index
    %c0_24 = arith.constant 0 : index
    %c0_25 = arith.constant 0 : index
    %25 = vector.load %arg2[%c4, %c0_24, %c0_25] : memref<9x8x8xf32, #tpu.memory_space<vmem>>, vector<1x8x8xf32>
    %26 = vector.shape_cast %25 : vector<1x8x8xf32> to vector<8x8xf32>
    %cst_26 = arith.constant dense<0.000000e+00> : vector<8x384xf32>
    %27 = tpu.matmul %26, %24, %cst_26 {dimension_numbers = #tpu.dot_dimension_numbers<[1], [0], [0], [1], [0, 0, 1, 1], [], []>} : vector<8x8xf32>, vector<8x384xf32>, vector<8x384xf32> -> vector<8x384xf32>
    %28 = arith.addf %22, %27 : vector<8x384xf32>
    %c0_27 = arith.constant 0 : index
    %c0_28 = arith.constant 0 : index
    %c20 = arith.constant 20 : index
    %29 = vector.load %arg1[%c0_27, %c0_28, %c20] : memref<1x8x512xf32, #tpu.memory_space<vmem>>, vector<1x8x384xf32>
    %30 = vector.shape_cast %29 : vector<1x8x384xf32> to vector<8x384xf32>
    %c5 = arith.constant 5 : index
    %c0_29 = arith.constant 0 : index
    %c0_30 = arith.constant 0 : index
    %31 = vector.load %arg2[%c5, %c0_29, %c0_30] : memref<9x8x8xf32, #tpu.memory_space<vmem>>, vector<1x8x8xf32>
    %32 = vector.shape_cast %31 : vector<1x8x8xf32> to vector<8x8xf32>
    %cst_31 = arith.constant dense<0.000000e+00> : vector<8x384xf32>
    %33 = tpu.matmul %32, %30, %cst_31 {dimension_numbers = #tpu.dot_dimension_numbers<[1], [0], [0], [1], [0, 0, 1, 1], [], []>} : vector<8x8xf32>, vector<8x384xf32>, vector<8x384xf32> -> vector<8x384xf32>
    %34 = arith.addf %28, %33 : vector<8x384xf32>
    %c0_32 = arith.constant 0 : index
    %c0_33 = arith.constant 0 : index
    %c36 = arith.constant 36 : index
    %35 = vector.load %arg1[%c0_32, %c0_33, %c36] : memref<1x8x512xf32, #tpu.memory_space<vmem>>, vector<1x8x384xf32>
    %36 = vector.shape_cast %35 : vector<1x8x384xf32> to vector<8x384xf32>
    %c6 = arith.constant 6 : index
    %c0_34 = arith.constant 0 : index
    %c0_35 = arith.constant 0 : index
    %37 = vector.load %arg2[%c6, %c0_34, %c0_35] : memref<9x8x8xf32, #tpu.memory_space<vmem>>, vector<1x8x8xf32>
    %38 = vector.shape_cast %37 : vector<1x8x8xf32> to vector<8x8xf32>
    %cst_36 = arith.constant dense<0.000000e+00> : vector<8x384xf32>
    %39 = tpu.matmul %38, %36, %cst_36 {dimension_numbers = #tpu.dot_dimension_numbers<[1], [0], [0], [1], [0, 0, 1, 1], [], []>} : vector<8x8xf32>, vector<8x384xf32>, vector<8x384xf32> -> vector<8x384xf32>
    %40 = arith.addf %34, %39 : vector<8x384xf32>
    %c0_37 = arith.constant 0 : index
    %c0_38 = arith.constant 0 : index
    %c37 = arith.constant 37 : index
    %41 = vector.load %arg1[%c0_37, %c0_38, %c37] : memref<1x8x512xf32, #tpu.memory_space<vmem>>, vector<1x8x384xf32>
    %42 = vector.shape_cast %41 : vector<1x8x384xf32> to vector<8x384xf32>
    %c7 = arith.constant 7 : index
    %c0_39 = arith.constant 0 : index
    %c0_40 = arith.constant 0 : index
    %43 = vector.load %arg2[%c7, %c0_39, %c0_40] : memref<9x8x8xf32, #tpu.memory_space<vmem>>, vector<1x8x8xf32>
    %44 = vector.shape_cast %43 : vector<1x8x8xf32> to vector<8x8xf32>
    %cst_41 = arith.constant dense<0.000000e+00> : vector<8x384xf32>
    %45 = tpu.matmul %44, %42, %cst_41 {dimension_numbers = #tpu.dot_dimension_numbers<[1], [0], [0], [1], [0, 0, 1, 1], [], []>} : vector<8x8xf32>, vector<8x384xf32>, vector<8x384xf32> -> vector<8x384xf32>
    %46 = arith.addf %40, %45 : vector<8x384xf32>
    %c0_42 = arith.constant 0 : index
    %c0_43 = arith.constant 0 : index
    %c38 = arith.constant 38 : index
    %47 = vector.load %arg1[%c0_42, %c0_43, %c38] : memref<1x8x512xf32, #tpu.memory_space<vmem>>, vector<1x8x384xf32>
    %48 = vector.shape_cast %47 : vector<1x8x384xf32> to vector<8x384xf32>
    %c8 = arith.constant 8 : index
    %c0_44 = arith.constant 0 : index
    %c0_45 = arith.constant 0 : index
    %49 = vector.load %arg2[%c8, %c0_44, %c0_45] : memref<9x8x8xf32, #tpu.memory_space<vmem>>, vector<1x8x8xf32>
    %50 = vector.shape_cast %49 : vector<1x8x8xf32> to vector<8x8xf32>
    %cst_46 = arith.constant dense<0.000000e+00> : vector<8x384xf32>
    %51 = tpu.matmul %50, %48, %cst_46 {dimension_numbers = #tpu.dot_dimension_numbers<[1], [0], [0], [1], [0, 0, 1, 1], [], []>} : vector<8x8xf32>, vector<8x384xf32>, vector<8x384xf32> -> vector<8x384xf32>
    %52 = arith.addf %46, %51 : vector<8x384xf32>
    %c0_47 = arith.constant 0 : index
    %c0_48 = arith.constant 0 : index
    %53 = vector.load %arg3[%c0_47, %c0_48] : memref<8x1xf32, #tpu.memory_space<vmem>>, vector<8x1xf32>
    %54 = vector.broadcast %53 : vector<8x1xf32> to vector<8x384xf32>
    %55 = arith.addf %52, %54 : vector<8x384xf32>
    %c0_49 = arith.constant 0 : index
    %c0_50 = arith.constant 0 : index
    %c0_51 = arith.constant 0 : index
    %56 = vector.load %arg4[%c0_49, %c0_50, %c0_51] : memref<1x8x384xf32, #tpu.memory_space<vmem>>, vector<1x8x384xf32>
    %57 = vector.shape_cast %56 : vector<1x8x384xf32> to vector<8x384xf32>
    %58 = vector.shape_cast %55 : vector<8x384xf32> to vector<1x8x384xf32>
    tpu.vector_store %arg4[%c0_49, %c0_50, %c0_51], %58 {strides = array<i32>} : memref<1x8x384xf32, #tpu.memory_space<vmem>>, vector<1x8x384xf32>,
    return
  }
  func.func @transform_0(%arg0: i32) -> (i32, i32, i32) {
    %c0_i32 = arith.constant 0 : i32
    %c0_i32_0 = arith.constant 0 : i32
    %c0_i32_1 = arith.constant 0 : i32
    return %arg0, %c0_i32, %c0_i32_0 : i32, i32, i32
  }
  func.func @transform_1(%arg0: i32) -> (i32, i32, i32) {
    %c0_i32 = arith.constant 0 : i32
    %c0_i32_0 = arith.constant 0 : i32
    %c0_i32_1 = arith.constant 0 : i32
    %c0_i32_2 = arith.constant 0 : i32
    return %c0_i32, %c0_i32_0, %c0_i32_1 : i32, i32, i32
  }
  func.func @transform_2(%arg0: i32) -> (i32, i32) {
    %c0_i32 = arith.constant 0 : i32
    %c0_i32_0 = arith.constant 0 : i32
    %c0_i32_1 = arith.constant 0 : i32
    return %c0_i32, %c0_i32_0 : i32, i32
  }
  func.func @transform_3(%arg0: i32) -> (i32, i32, i32) {
    %c0_i32 = arith.constant 0 : i32
    %c0_i32_0 = arith.constant 0 : i32
    %c0_i32_1 = arith.constant 0 : i32
    return %arg0, %c0_i32, %c0_i32_0 : i32, i32, i32
  }
}

</mosaic_0001>

<bundles_post_ra>
// kernel: tpu_custom_call.1
= control target key start
LH: loop header
LB: loop body
LE: loop exit
PB: predicated region body
PF: predicated region fallthrough
CT: control target
= control target key end

     0   :  { %8 = vsyncpa [#allocation3], 0  ;;  %s1446_s0 = inlined_call_operand.vmem [shape: f32[2,8,512], index: 0, kind: input, shape index: {}]   ;;  %s1447_s1 = inlined_call_operand.vmem [shape: f32[9,8,8], index: 1, kind: input, shape index: {}]   ;;  %s1448_s2 = inlined_call_operand.vmem [shape: f32[8,1], index: 2, kind: input, shape index: {}]   ;;  %s1449_s3 = inlined_call_operand.hbm [shape: f32[2,8,384], index: 3, kind: output, shape index: {}]  }
   0x1   :  { %10 = vsyncpa [#allocation3 + $0x1], 0  ;;  %s1264_s12 = smov 0   ;;  %s1266_s13 = smov 0  }
   0x2   :  { %s1268_s14 = smov 0   ;;  %s1270_s15 = smov 0  }
   0x3 LB: > { %s1285_s16 = sadd.s32 4294967295, %s1233_s15   ;;  %s994_s17 = sadd.s32 4294967294, %s1233_s15   ;;  %s1233_s15 = sphi %s1270_s15, %s1455_s15   ;;  %s1229_s14 = sphi %s1268_s14, %s1454_s14   ;;  %s1225_s13 = sphi %s1266_s13, %s1453_s13   ;;  %s1221_s12 = sphi %s1264_s12, %s1452_s12  }
   0x4   : > { %s1289_s18 = sadd.s32 1, %s1233_s15   ;;  %s91_s19 = sadd.s32 1, %s1229_s14 }
   0x5   : > { %s88_s20 = ssub.s32 %s1233_s15, %s1289_s18  ;;  %p101_p0 = scmp.ne.s32.totalorder %s1229_s14, %s1225_s13 }
   0x6   : > { %p89_p1 = scmp.eq.s32.totalorder %s88_s20, 0  ;;  %p102_p2 = scmp.eq.s32.totalorder %s1285_s16, 1 }
   0x7   : > { %p107_p3 = scmp.ne.s32.totalorder %s1225_s13, %s1221_s12  ;;  %p108_p4 = scmp.eq.s32.totalorder %s994_s17, 1 }
   0x8   : > { %s1300_s21 = scalar_select %p89_p1, %s1229_s14, %s91_s19  }
   0x9   : > { %p1302_p5 = por %p102_p2, %p101_p0  ;;  %p1306_p6 = por %p108_p4, %p107_p3 }
   0xa   : > { %p997_p7 = scmp.ge.s32.totalorder %s1233_s15, 1  ;;  %p140_p8 = scmp.lt.s32.totalorder %s1233_s15, 3 }
   0xc   : > { %p141_p9 = pnand %p997_p7, %p140_p8 }
   0xd   : > { %p164_p10 = scmp.lt.s32.totalorder (!%p141_p9), %s1285_s16, 1  ;;  %s1235_s29 = smov (!%p141_p9), 127  }
   0xe   : > { %144 = sbr.rel (%p141_p9) target bundleno = 336 (0x150), region = 32  ;;  %s1236_s30 = smov (!%p141_p9), 126  }
   0xf   : > { %s1237_s4 = smov (!%p141_p9), 110   ;;  %s1238_s5 = smov (!%p141_p9), 109  }
  0x10   : > { %s1239_s6 = smov (!%p141_p9), 108   ;;  %s1240_s7 = smov (!%p141_p9), 92  }
  0x11   : > { %s1241_s8 = smov (!%p141_p9), 91   ;;  %s1242_s9 = smov (!%p141_p9), 90  }
  0x12   : > { %s161_s17 = sand.u32 (!%p141_p9), 1, %s1225_s13   ;;  %s1040_s20 = smul.u32 (!%p141_p9), 24, %s1285_s16 }
  0x13   : > { %s165_s24 = scalar_select %p164_p10, %s1285_s16, 1  ;;  %vm198_vm0 = vcmask 64512   ;;  %v1328_v8 = vld [vmem:[%s1447_s1] sm:$0xff]  ;;  %vm191_vm1 = vcmask 1039360   ;;  %vm335_vm2 = vcmask 1031168   ;;  %vm418_vm3 = vcmask 900096  }
  0x14   : > { %v1000_v18 = vld [vmem:[%s1447_s1 + $0x8] sm:$0xff]  ;;  %v1007_v37 = vld [vmem:[%s1447_s1 + $0x10] sm:$0xff]  ;;  %vm584_vm4 = vcmask 883712   ;;  %vm501_vm5 = vcmask 891904   ;;  %v1011_v49 = vld [vmem:[%s1447_s1 + $0x18] sm:$0xff]  ;;  %vm667_vm6 = vcmask 752640   ;;  %s930_s26 = scalar_lea.hbm %s1449_s3, %s1040_s20 }
  0x15   : > { %s1038_s25 = sshll.u32 %s165_s24, 5  ;;  %v1015_v62 = vld [vmem:[%s1447_s1 + $0x20] sm:$0xff]  ;;  %vm750_vm7 = vcmask 744448   ;;  %vm833_vm8 = vcmask 736256   ;;  %s1039_s19 = smul.u32 24, %s161_s17 }
  0x16   : > { %s168_s28 = scalar_lea.vmem %s1446_s0, %s1038_s25 }
  0x17   : > { %v1317_v0 = vld [vmem:[%s168_s28 + $0x10] sm:$0xff]  ;;  %v176_v1 = vld [vmem:[%s168_s28 + $0x18] sm:$0xff]  ;;  %v173_v2 = vld [vmem:[%s168_s28] sm:$0xff]  ;;  %s163_s27 = scalar_lea.vmem [#allocation2], %s1039_s19 }
  0x18   : > { %v1089_v3 = vpack.i.bf16 %v176_v1, %v1317_v0  ;;  %v1320_v4 = vld [vmem:[%s168_s28 + $0x8] sm:$0xff]  ;;  %280 = vmatpush.msra.mxu3 %v173_v2  ;;  %v1114_v7 = vpack.i.bf16 %v176_v1, %v173_v2  ;;  %s932_s16 = sshll.u32 %s163_s27, 4  ;;  %s934_s28 = sshll.u32 %s930_s26, 4  ;;  %s933_s16 = int_to_ptr.vmem [resolvable:$true] %s932_s16  ;;  %s935_s28 = int_to_ptr.hbm [resolvable:$true] %s934_s28 }
  0x19   : > { %v1099_v5 = vpack.i.bf16 %v1320_v4, %v173_v2  ;;  %v1109_v6 = vpack.i.bf16 %v1317_v0, %v1320_v4  ;;  %1004 = vmatmul.msk.f32.vlgmr.msra.gmra.mxu3 %vm198_vm0, %v1328_v8  ;;  %v1019_v1 = vld [vmem:[%s1447_s1 + $0x28] sm:$0xff] }
  0x1a   : > { %1090 = vrot.lane.b32.xlu0 %v1089_v3, %s1235_s29 }
  0x1b   : > { %1100 = vrot.lane.b32.xlu1 %v1099_v5, %s1236_s30  ;;  %1110 = vrot.lane.b32.xlu2 %v1109_v6, %s1237_s4 }
  0x22   : > { %1095 = vrot.lane.b32.xlu0 %v1099_v5, %s1235_s29  ;;  %s919_s29 = scalar_lea.sflag [#allocation3], %s161_s17 }
  0x23   : > { %1105 = vrot.lane.b32.xlu1 %v1089_v3, %s1236_s30  ;;  %1115 = vrot.lane.b32.xlu2 %v1114_v7, %s1237_s4  ;;  %s1185_s30 = sshra.s32 %s935_s28, 4  ;;  %s1186_s30 = int_to_ptr.hbm [resolvable:$true] %s1185_s30 }
  0x24   : > { %s1187_s4 = scalar_lea.hbm %s1186_s30, 24  ;;  %p1192_p0 = scmp.lt.s32.totalorder %s1186_s30, %s1449_s3 }
  0x25   : > { %p1188_p11 = scmp.ne.s32.totalorder %s1186_s30, %s1187_s4 }
  0x27   : > { %p1189_p12 = pnand %p1188_p11, %p1302_p5 }
  0x29   : > { %p1190_p13 = pneg %p1189_p12 }
  0x2a   : > { %1120 = vrot.lane.b32.xlu0 %v1089_v3, %s1238_s5 }
  0x2b   : > { %1125 = vrot.lane.b32.xlu1 %v1099_v5, %s1238_s5  ;;  %1130 = vrot.lane.b32.xlu2 %v1099_v5, %s1239_s6 }
  0x32   : > { %1135 = vrot.lane.b32.xlu0 %v1099_v5, %s1240_s7 }
  0x33   : > { %1140 = vrot.lane.b32.xlu1 %v1089_v3, %s1239_s6  ;;  %1145 = vrot.lane.b32.xlu2 %v1089_v3, %s1240_s7  ;;  %s1191_s7 = scalar_lea.hbm %s1449_s3, 48 }
  0x34   : > { %p1193_p1 = scmp.lt.s32.totalorder %s1191_s7, %s1187_s4 }
  0x36   : > { %p1194_p2 = por %p1193_p1, %p1192_p0 }
  0x38   : > { %p1195_p3 = pnand %p1194_p2, %p1190_p13 }
  0x3a   : > { %1150 = vrot.lane.b32.xlu0 %v1109_v6, %s1241_s8  ;;  %v1243_v6 = vmov 0  }
  0x3b   : > { %1155 = vrot.lane.b32.xlu1 %v1114_v7, %s1241_s8  ;;  %1160 = vrot.lane.b32.xlu2 %v1089_v3, %s1242_s9  ;;  %v906_v3 = vld [vmem:[%s1448_s2] sm:$0xff] }
  0x3c   : > { %1169 = vset.pattern.permute.xlu1 %v1243_v6  ;;  %1170 = vset.pattern.permute.xlu0 %v1243_v6 }
  0x42   : > { %1165 = vrot.lane.b32.xlu0 %v1099_v5, %s1242_s9 }
  0x43   : > { %909 = vperm.xlu1 %1169, %v906_v3  }
  0x75   : > { %v1111_v9 = vpop.permute.xlu2 %1110 }
  0x76   : > { %v1113_v11 = vunpack.i.h.bf16 %v1111_v9  ;;  %v1112_v12 = vunpack.i.l.bf16 %v1111_v9 }
  0x78   : > { %v420_v22 = vsel %vm418_vm3, %v1112_v12, %v1113_v11 }
  0x7d   : > { %v1116_v19 = vpop.permute.xlu2 %1115 }
  0x7e   : > { %v1118_v27 = vunpack.i.h.bf16 %v1116_v19  ;;  %v1117_v30 = vunpack.i.l.bf16 %v1116_v19 }
  0x80   : > { %v421_v38 = vsel %vm418_vm3, %v1113_v11, %v1118_v27  ;;  %v419_v40 = vsel %vm418_vm3, %v1117_v30, %v1112_v12 }
  0x85   : > { %v1131_v31 = vpop.permute.xlu2 %1130 }
  0x86   : > { %v1133_v34 = vunpack.i.h.bf16 %v1131_v31  ;;  %v1132_v35 = vunpack.i.l.bf16 %v1131_v31 }
  0x88   : > { %v585_v41 = vsel %vm584_vm4, %v1132_v35, %v1133_v34 }
  0x8c   : > { %v1091_v10 = vpop.permute.xlu0 %1090 }
  0x8d   : > { %v1093_v13 = vunpack.i.h.bf16 %v1091_v10  ;;  %v1092_v14 = vunpack.i.l.bf16 %v1091_v10  ;;  %v1101_v15 = vpop.permute.xlu1 %1100  ;;  %v1146_v51 = vpop.permute.xlu2 %1145 }
  0x8e   : > { %v1103_v16 = vunpack.i.h.bf16 %v1101_v15  ;;  %v1102_v17 = vunpack.i.l.bf16 %v1101_v15  ;;  %v1147_v53 = vunpack.i.l.bf16 %v1146_v51 }
  0x8f   : > { %v194_v20 = vsel %vm191_vm1, %v1092_v14, %v1093_v13 }
  0x90   : > { %257 = vmatpush.msra.mxu2 %v194_v20  ;;  %v336_v21 = vsel %vm335_vm2, %v1102_v17, %v1103_v16 }
  0x91   : > { %1003 = vmatmul.msk.f32.vlgmr.msra.gmra.mxu2 %vm198_vm0, %v1000_v18 }
  0x92   : > { %360 = vmatpush.msrb.mxu2 %v336_v21 }
  0x94   : > { %463 = vmatpush.msra.mxu2 %v420_v22  ;;  %v1096_v23 = vpop.permute.xlu0 %1095 }
  0x95   : > { %v1106_v24 = vpop.permute.xlu1 %1105  ;;  %v1098_v25 = vunpack.i.h.bf16 %v1096_v23  ;;  %v1097_v26 = vunpack.i.l.bf16 %v1096_v23  ;;  %v1161_v2 = vpop.permute.xlu2 %1160 }
  0x96   : > { %v1108_v28 = vunpack.i.h.bf16 %v1106_v24  ;;  %v1107_v29 = vunpack.i.l.bf16 %v1106_v24  ;;  %v1163_v10 = vunpack.i.h.bf16 %v1161_v2  ;;  %v1162_v11 = vunpack.i.l.bf16 %v1161_v2  ;;  %v1027_v24 = vld [vmem:[%s1447_s1 + $0x38] sm:$0xff] }
  0x97   : > { %v192_v32 = vsel %vm191_vm1, %v1097_v26, %v1098_v25  ;;  %v193_v33 = vsel %vm191_vm1, %v1098_v25, %v1092_v14  ;;  %v1031_v26 = vld [vmem:[%s1447_s1 + $0x40] sm:$0xff] }
  0x98   : > { %217 = vmatpush.msra.mxu0 %v192_v32  ;;  %237 = vmatpush.msra.mxu1 %v193_v33  ;;  %v337_v36 = vsel %vm335_vm2, %v1103_v16, %v1107_v29  ;;  %v338_v39 = vsel %vm335_vm2, %v1107_v29, %v1108_v28  ;;  %v1023_v16 = vld [vmem:[%s1447_s1 + $0x30] sm:$0xff]  ;;  %v836_v19 = vsel %vm833_vm8, %v1162_v11, %v1163_v10 }
  0x99   : > { %380 = vmatpush.msrb.mxu3 %v337_v36  ;;  %1001 = vmatmul.msk.f32.vlgmr.msra.gmra.mxu0 %vm198_vm0, %v1000_v18 }
  0x9a   : > { %1002 = vmatmul.msk.f32.vlgmr.msra.gmra.mxu1 %vm198_vm0, %v1000_v18  ;;  %300 = vmatpush.msrb.mxu0 %v1320_v4  ;;  %v1148_v4 = vunpack.i.h.bf16 %v1146_v51 }
  0x9b   : > { %320 = vmatpush.msrb.mxu1 %v1317_v0  ;;  %1008 = vmatmul.msk.f32.vlgmr.msrb.gmra.mxu2 %vm198_vm0, %v1007_v37 }
  0x9c   : > { %483 = vmatpush.msra.mxu3 %v421_v38  ;;  %400 = vmatpush.msra.mxu0 %v338_v39  ;;  %v1121_v42 = vpop.permute.xlu0 %1120  ;;  %v670_v14 = vsel %vm667_vm6, %v1147_v53, %v1148_v4  ;;  %v282_v30 = vpop.f32.mrf.mxu3 }
  0x9d   : > { %443 = vmatpush.msra.mxu1 %v419_v40  ;;  %v1126_v43 = vpop.permute.xlu1 %1125  ;;  %1009 = vmatmul.msk.f32.vlgmr.msrb.gmra.mxu3 %vm198_vm0, %v1007_v37  ;;  %v1123_v44 = vunpack.i.h.bf16 %v1121_v42  ;;  %v1122_v45 = vunpack.i.l.bf16 %v1121_v42 }
  0x9e   : > { %v1128_v46 = vunpack.i.h.bf16 %v1126_v43  ;;  %v1127_v47 = vunpack.i.l.bf16 %v1126_v43  ;;  %609 = vmatpush.msrb.mxu3 %v585_v41 }
  0x9f   : > { %v504_v48 = vsel %vm501_vm5, %v1122_v45, %v1123_v44 }
  0xa0   : > { %v503_v50 = vsel %vm501_vm5, %v1128_v46, %v1122_v45  ;;  %566 = vmatpush.msrb.mxu2 %v504_v48  ;;  %v502_v52 = vsel %vm501_vm5, %v1127_v47, %v1128_v46 }
  0xa1   : > { %1005 = vmatmul.msk.f32.vlgmr.msrb.gmra.mxu0 %vm198_vm0, %v1328_v8 }
  0xa2   : > { %1006 = vmatmul.msk.f32.vlgmr.msrb.gmra.mxu1 %vm198_vm0, %v1328_v8  ;;  %526 = vmatpush.msrb.mxu0 %v502_v52 }
  0xa3   : > { %1013 = vmatmul.msk.f32.vlgmr.msra.gmra.mxu2 %vm198_vm0, %v1011_v49  ;;  %546 = vmatpush.msrb.mxu1 %v503_v50 }
  0xa4   : > { %v1136_v54 = vpop.permute.xlu0 %1135 }
  0xa5   : > { %v1141_v55 = vpop.permute.xlu1 %1140  ;;  %1014 = vmatmul.msk.f32.vlgmr.msra.gmra.mxu3 %vm198_vm0, %v1011_v49  ;;  %v1138_v56 = vunpack.i.h.bf16 %v1136_v54  ;;  %v1137_v57 = vunpack.i.l.bf16 %v1136_v54 }
  0xa6   : > { %v1143_v58 = vunpack.i.h.bf16 %v1141_v55  ;;  %v1142_v59 = vunpack.i.l.bf16 %v1141_v55 }
  0xa7   : > { %v668_v60 = vsel %vm667_vm6, %v1137_v57, %v1138_v56  ;;  %v669_v61 = vsel %vm667_vm6, %v1138_v56, %v1147_v53 }
  0xa8   : > { %v586_v63 = vsel %vm584_vm4, %v1133_v34, %v1142_v59  ;;  %692 = vmatpush.msra.mxu2 %v668_v60  ;;  %712 = vmatpush.msra.mxu3 %v669_v61  ;;  %v587_v0 = vsel %vm584_vm4, %v1142_v59, %v1143_v58 }
  0xa9   : > { %1010 = vmatmul.msk.f32.vlgmr.msra.gmra.mxu0 %vm198_vm0, %v1007_v37 }
  0xaa   : > { %1012 = vmatmul.msk.f32.vlgmr.msra.gmra.mxu1 %vm198_vm0, %v1011_v49  ;;  %629 = vmatpush.msra.mxu0 %v586_v63 }
  0xab   : > { %1018 = vmatmul.msk.f32.vlgmr.msrb.gmra.mxu2 %vm198_vm0, %v1015_v62  ;;  %649 = vmatpush.msra.mxu1 %v587_v0 }
  0xac   : > { %v1151_v5 = vpop.permute.xlu0 %1150 }
  0xad   : > { %1020 = vmatmul.msk.f32.vlgmr.msrb.gmra.mxu3 %vm198_vm0, %v1019_v1  ;;  %v1156_v7 = vpop.permute.xlu1 %1155  ;;  %v1153_v8 = vunpack.i.h.bf16 %v1151_v5  ;;  %v1152_v9 = vunpack.i.l.bf16 %v1151_v5 }
  0xae   : > { %v1158_v12 = vunpack.i.h.bf16 %v1156_v7  ;;  %v1157_v13 = vunpack.i.l.bf16 %v1156_v7 }
  0xaf   : > { %v752_v15 = vsel %vm750_vm7, %v1152_v9, %v1153_v8 }
  0xb0   : > { %v751_v17 = vsel %vm750_vm7, %v1157_v13, %v1152_v9  ;;  %795 = vmatpush.msrb.mxu2 %v752_v15  ;;  %v753_v18 = vsel %vm750_vm7, %v1153_v8, %v1158_v12 }
  0xb1   : > { %1016 = vmatmul.msk.f32.vlgmr.msrb.gmra.mxu0 %vm198_vm0, %v1015_v62  ;;  %815 = vmatpush.msrb.mxu3 %v753_v18 }
  0xb2   : > { %1017 = vmatmul.msk.f32.vlgmr.msrb.gmra.mxu1 %vm198_vm0, %v1015_v62  ;;  %732 = vmatpush.msrb.mxu0 %v670_v14 }
  0xb3   : > { %1024 = vmatmul.msk.f32.vlgmr.msra.gmra.mxu2 %vm198_vm0, %v1023_v16  ;;  %775 = vmatpush.msrb.mxu1 %v751_v17 }
  0xb4   : > { %v1166_v20 = vpop.permute.xlu0 %1165  ;;  %898 = vmatpush.msra.mxu2 %v836_v19 }
  0xb5   : > { %1025 = vmatmul.msk.f32.vlgmr.msra.gmra.mxu3 %vm198_vm0, %v1023_v16  ;;  %v1168_v21 = vunpack.i.h.bf16 %v1166_v20  ;;  %v1167_v22 = vunpack.i.l.bf16 %v1166_v20  ;;  %v910_v7 = vpop.permute.xlu1 %909 }
  0xb7   : > { %v834_v23 = vsel %vm833_vm8, %v1167_v22, %v1168_v21  ;;  %v835_v25 = vsel %vm833_vm8, %v1168_v21, %v1162_v11 }
  0xb9   : > { %1021 = vmatmul.msk.f32.vlgmr.msra.gmra.mxu0 %vm198_vm0, %v1019_v1 }
  0xba   : > { %1022 = vmatmul.msk.f32.vlgmr.msra.gmra.mxu1 %vm198_vm0, %v1019_v1  ;;  %858 = vmatpush.msra.mxu0 %v834_v23 }
  0xbb   : > { %1029 = vmatmul.msk.f32.vlgmr.msrb.gmra.mxu2 %vm198_vm0, %v1027_v24  ;;  %878 = vmatpush.msra.mxu1 %v835_v25 }
  0xbd   : > { %1030 = vmatmul.msk.f32.vlgmr.msrb.gmra.mxu3 %vm198_vm0, %v1027_v24 }
  0xc1   : > { %1026 = vmatmul.msk.f32.vlgmr.msrb.gmra.mxu0 %vm198_vm0, %v1023_v16 }
  0xc2   : > { %1028 = vmatmul.msk.f32.vlgmr.msrb.gmra.mxu1 %vm198_vm0, %v1027_v24 }
  0xc3   : > { %1034 = vmatmul.msk.f32.vlgmr.msra.gmra.mxu2 %vm198_vm0, %v1031_v26 }
  0xc9   : > { %1032 = vmatmul.msk.f32.vlgmr.msra.gmra.mxu0 %vm198_vm0, %v1031_v26 }
  0xca   : > { %1033 = vmatmul.msk.f32.vlgmr.msra.gmra.mxu1 %vm198_vm0, %v1031_v26 }
 0x114   : > { %v259_v27 = vpop.f32.mrf.mxu2 }
 0x116   : > { %v219_v28 = vpop.f32.mrf.mxu0 }
 0x117   : > { %v239_v29 = vpop.f32.mrf.mxu1  ;;  %v283_v47 = vadd.f32 %v282_v30, %v219_v28 }
 0x11e   : > { %v362_v31 = vpop.f32.mrf.mxu2  ;;  %v302_v32 = vpop.f32.mrf.mxu0 }
 0x11f   : > { %v322_v33 = vpop.f32.mrf.mxu1  ;;  %v303_v44 = vadd.f32 %v302_v32, %v239_v29  ;;  %v405_v51 = vadd.f32 %v362_v31, %v283_v47 }
 0x120   : > { %v382_v34 = vpop.f32.mrf.mxu3  ;;  %v323_v43 = vadd.f32 %v322_v33, %v259_v27 }
 0x121   : > { %v406_v52 = vadd.f32 %v382_v34, %v303_v44 }
 0x126   : > { %v465_v35 = vpop.f32.mrf.mxu2  ;;  %v402_v36 = vpop.f32.mrf.mxu0 }
 0x127   : > { %v445_v37 = vpop.f32.mrf.mxu1  ;;  %v407_v48 = vadd.f32 %v402_v36, %v323_v43  ;;  %v489_v55 = vadd.f32 %v465_v35, %v406_v52 }
 0x128   : > { %v485_v38 = vpop.f32.mrf.mxu3  ;;  %v488_v53 = vadd.f32 %v445_v37, %v405_v51 }
 0x129   : > { %v490_v54 = vadd.f32 %v485_v38, %v407_v48 }
 0x12e   : > { %v568_v39 = vpop.f32.mrf.mxu2  ;;  %v528_v40 = vpop.f32.mrf.mxu0 }
 0x12f   : > { %v548_v41 = vpop.f32.mrf.mxu1  ;;  %v573_v56 = vadd.f32 %v568_v39, %v490_v54  ;;  %v571_v57 = vadd.f32 %v528_v40, %v488_v53 }
 0x130   : > { %v611_v42 = vpop.f32.mrf.mxu3  ;;  %v572_v58 = vadd.f32 %v548_v41, %v489_v55 }
 0x131   : > { %v654_v0 = vadd.f32 %v611_v42, %v571_v57 }
 0x136   : > { %v694_v45 = vpop.f32.mrf.mxu2  ;;  %v631_v46 = vpop.f32.mrf.mxu0 }
 0x137   : > { %v651_v49 = vpop.f32.mrf.mxu1  ;;  %v655_v63 = vadd.f32 %v631_v46, %v572_v58  ;;  %v737_v3 = vadd.f32 %v694_v45, %v654_v0 }
 0x138   : > { %v714_v50 = vpop.f32.mrf.mxu3  ;;  %v656_v61 = vadd.f32 %v651_v49, %v573_v56 }
 0x139   : > { %v738_v4 = vadd.f32 %v714_v50, %v655_v63 }
 0x13e   : > { %v797_v59 = vpop.f32.mrf.mxu2  ;;  %v734_v60 = vpop.f32.mrf.mxu0 }
 0x13f   : > { %v777_v62 = vpop.f32.mrf.mxu1  ;;  %v739_v1 = vadd.f32 %v734_v60, %v656_v61  ;;  %v821_v8 = vadd.f32 %v797_v59, %v738_v4 }
 0x140   : > { %v817_v2 = vpop.f32.mrf.mxu3  ;;  %v820_v5 = vadd.f32 %v777_v62, %v737_v3 }
 0x141   : > { %v822_v6 = vadd.f32 %v817_v2, %v739_v1 }
 0x146   : > { %v900_v9 = vpop.f32.mrf.mxu2  ;;  %v860_v10 = vpop.f32.mrf.mxu0 }
 0x147   : > { %v905_v11 = vadd.f32 %v900_v9, %v822_v6  ;;  %v903_v12 = vadd.f32 %v860_v10, %v820_v5  ;;  %v880_v13 = vpop.f32.mrf.mxu1 }
 0x148   : > { %v904_v14 = vadd.f32 %v880_v13, %v821_v8 }
 0x149   : > { %v914_v15 = vadd.f32 %v910_v7, %v905_v11  ;;  %v912_v16 = vadd.f32 %v910_v7, %v903_v12 }
 0x14a   : > { %v913_v17 = vadd.f32 %v910_v7, %v904_v14 }
 0x14b   : > { %917 = vst [vmem:[%s163_s27 + $0x10] sm:$0xff] %v914_v15 }
 0x14c   : > { %915 = vst [vmem:[%s163_s27] sm:$0xff] %v912_v16 }
 0x14d   : > { %916 = vst [vmem:[%s163_s27 + $0x8] sm:$0xff] %v913_v17 }
 0x14e   : > { %1198 = shalt.err (!%p1195_p3)
}
 0x14f   : > { %1041 = dma.vmem_to_hbm [thread:$0]  (%p1302_p5), %s933_s16, 384, %s935_s28, %s919_s29  }
 0x150 PF: > { %p1047_p4 = scmp.ge.s32.totalorder %s1233_s15, 2  ;;  %s946_s10 = sand.u32 1, %s1221_s12  }
 0x151   : > { %s947_s11 = scalar_lea.sflag [#allocation3], %s946_s10 }
 0x152   : > { %p1044_p7 = pnand %p1047_p4, %p1306_p6 }
 0x154   : > { %p1045_p8 = pneg %p1044_p7 }
 0x156   : > { %1216 = dma.done.wait (%p1045_p8), %s947_s11, 384  }
 0x157   : > { %1218 = vsyncadd (%p1045_p8), %s947_s11, 4294966912  ;;  %p13_p9 = scmp.ge.s32.totalorder %s1289_s18, 4   ;;  %s1452_s12 = smov %s1225_s13 }
 0x158   : > { %s1453_s13 = smov %s1229_s14  ;;  %s1454_s14 = smov %s1300_s21 }
 0x159   : > { %s1455_s15 = smov %s1289_s18  ;;  %15 = sbr.rel (!%p13_p9) target bundleno = 3 (0x3), region = 75 }
 0x15e   :  { %953 = vsyncpa [#allocation3], 1 }
 0x15f   :  { %955 = vsyncpa [#allocation3 + $0x1], 1 }

</bundles_post_ra>
